<compile_context>
chip_gen: v7x
topology: tpu7x:2x2x1
jax: 0.10.0
libtpu: 0.0.40
codegen_flags: <defaults>
</compile_context>

<pallas_src>
import functools
import math

import jax
import jax.numpy as jnp
from jax.experimental import pallas as pl
from jax.experimental.pallas import tpu as pltpu


def _round_up(n, m):
    return ((n + m - 1) // m) * m


# ----------------------------- Pallas kernel --------------------------------

def _grn_kernel(*refs, has_skip, eps):
    """Fused GRN block over one tile of rows.

    refs (has_skip=True):
      x(Tn,Din), w1(Din,H), b1(1,H), w2(H,Do), b2(1,Do), wg(Do,Do), bg(1,Do),
      ws(Din,Do), bs(1,Do), gamma(1,Do), beta(1,Do), out(Tn,Do)
    refs (has_skip=False): same without ws/bs (residual = x).
    """
    if has_skip:
        (x_ref, w1_ref, b1_ref, w2_ref, b2_ref, wg_ref, bg_ref,
         ws_ref, bs_ref, gamma_ref, beta_ref, o_ref) = refs
    else:
        (x_ref, w1_ref, b1_ref, w2_ref, b2_ref, wg_ref, bg_ref,
         gamma_ref, beta_ref, o_ref) = refs

    x = x_ref[...]

    # residual / skip path
    if has_skip:
        residual = (jnp.dot(x, ws_ref[...], preferred_element_type=jnp.float32)
                    + bs_ref[...])
    else:
        residual = x

    # fc1 + ELU  (alpha = 1.0)
    h = jnp.dot(x, w1_ref[...], preferred_element_type=jnp.float32) + b1_ref[...]
    h = jnp.where(h > 0, h, jnp.exp(jnp.minimum(h, 0.0)) - 1.0)
    # TODO(synk): training-mode stochastic dropout (p=0.1) not implemented
    # (inference-mode identity here).

    # fc2
    y = jnp.dot(h, w2_ref[...], preferred_element_type=jnp.float32) + b2_ref[...]

    # gate: sigmoid(Linear(y)) * y, then residual add
    g_logits = (jnp.dot(y, wg_ref[...], preferred_element_type=jnp.float32)
                + bg_ref[...])
    gate = 1.0 / (1.0 + jnp.exp(-g_logits))
    z = gate * y + residual

    # LayerNorm over the feature dim (biased variance, PyTorch semantics)
    mean = jnp.mean(z, axis=-1, keepdims=True)
    zc = z - mean
    var = jnp.mean(zc * zc, axis=-1, keepdims=True)
    zn = zc * jax.lax.rsqrt(var + eps)
    o_ref[...] = (zn * gamma_ref[...] + beta_ref[...]).astype(o_ref.dtype)


# ------------------------------ JAX wrapper ----------------------------------

def grn_forward(x, params, *, tile_n=512, eps=1e-5):
    """x: (..., input_dim) float32 -> (..., output_dim) float32."""
    *lead, d_in = x.shape
    x2 = x.reshape(-1, d_in).astype(jnp.float32)
    n = x2.shape[0]

    has_skip = ("ws" in params) and (params["ws"] is not None)
    d_out = params["w2"].shape[1]

    # Row tiling: pad N to a multiple of the row tile.  LayerNorm is per-row,
    # so padded rows are independent junk that we slice off afterwards.
    tile_n = max(8, min(tile_n, _round_up(n, 8)))
    n_pad = _round_up(n, tile_n)
    if n_pad != n:
        x2 = jnp.pad(x2, ((0, n_pad - n), (0, 0)))

    grid = (n_pad // tile_n,)

    def row_spec(d):
        return pl.BlockSpec((tile_n, d), lambda i: (i, 0))

    def full_spec(a):
        nd = a.ndim
        return pl.BlockSpec(a.shape, lambda i, _nd=nd: (0,) * _nd)

    inputs = [
        x2,
        params["w1"], params["b1"].reshape(1, -1),
        params["w2"], params["b2"].reshape(1, -1),
        params["wg"], params["bg"].reshape(1, -1),
    ]
    if has_skip:
        inputs += [params["ws"], params["bs"].reshape(1, -1)]
    inputs += [params["gamma"].reshape(1, -1), params["beta"].reshape(1, -1)]

    in_specs = [row_spec(d_in)] + [full_spec(a) for a in inputs[1:]]

    kernel = functools.partial(_grn_kernel, has_skip=has_skip, eps=eps)

    out = pl.pallas_call(
        kernel,
        out_shape=jax.ShapeDtypeStruct((n_pad, d_out), jnp.float32),
        grid=grid,
        in_specs=in_specs,
        out_specs=row_spec(d_out),
        compiler_params=pltpu.CompilerParams(
            dimension_semantics=("parallel",)),
    )(*inputs)

    out = out[:n]
    return out.reshape(*lead, d_out)


# ------------------------------ reference ------------------------------------

def grn_reference(x, params, eps=1e-5):
    if "ws" in params:
        residual = x @ params["ws"] + params["bs"]
    else:
        residual = x
    h = x @ params["w1"] + params["b1"]
    h = jnp.where(h > 0, h, jnp.exp(jnp.minimum(h, 0.0)) - 1.0)
    y = h @ params["w2"] + params["b2"]
    g = jax.nn.sigmoid(y @ params["wg"] + params["bg"])
    z = g * y + residual
    mean = jnp.mean(z, axis=-1, keepdims=True)
    var = jnp.mean((z - mean) ** 2, axis=-1, keepdims=True)
    return (z - mean) / jnp.sqrt(var + eps) * params["gamma"] + params["beta"]


# --------------------------- parameter init ----------------------------------

def init_grn_params(key, input_dim, hidden_dim, output_dim=None):
    if output_dim is None:
        output_dim = input_dim
    ks = jax.random.split(key, 8)

    def linear_init(kw, kb, fan_in, fan_out):
        bound = 1.0 / math.sqrt(fan_in)
        w = jax.random.uniform(kw, (fan_in, fan_out), jnp.float32, -bound, bound)
        b = jax.random.uniform(kb, (fan_out,), jnp.float32, -bound, bound)
        return w, b

    w1, b1 = linear_init(ks[0], ks[1], input_dim, hidden_dim)
    w2, b2 = linear_init(ks[2], ks[3], hidden_dim, output_dim)
    wg, bg = linear_init(ks[4], ks[5], output_dim, output_dim)
    params = dict(
        w1=w1, b1=b1, w2=w2, b2=b2, wg=wg, bg=bg,
        gamma=jnp.ones((output_dim,), jnp.float32),
        beta=jnp.zeros((output_dim,), jnp.float32),
    )
    if input_dim != output_dim:
        ws, bs = linear_init(ks[6], ks[7], input_dim, output_dim)
        params["ws"] = ws
        params["bs"] = bs
    return params


# --------------------------------- main ---------------------------------------

if __name__ == "__main__":
    batch, seq, input_dim, hidden_dim = 2, 8, 16, 32

    key = jax.random.PRNGKey(0)
    kx, kp1, kp2 = jax.random.split(key, 3)
    x = jax.random.normal(kx, (batch, seq, input_dim), jnp.float32)

    fwd = jax.jit(grn_forward)

    # Case 1: output_dim == input_dim  (skip = Identity, module default)
    p_id = init_grn_params(kp1, input_dim, hidden_dim)
    out_id = fwd(x, p_id)
    jax.block_until_ready(out_id)
    assert out_id.shape == (batch, seq, input_dim), out_id.shape
    assert out_id.dtype == jnp.float32
    err_id = jnp.max(jnp.abs(out_id - grn_reference(x, p_id)))
    assert float(err_id) < 5e-2, float(err_id)

    # Case 2: output_dim != input_dim  (skip = Linear)
    output_dim2 = 24
    p_sk = init_grn_params(kp2, input_dim, hidden_dim, output_dim2)
    out_sk = fwd(x, p_sk)
    jax.block_until_ready(out_sk)
    assert out_sk.shape == (batch, seq, output_dim2), out_sk.shape
    err_sk = jnp.max(jnp.abs(out_sk - grn_reference(x, p_sk)))
    assert float(err_sk) < 5e-2, float(err_sk)

    print("KERNEL_OK")
</pallas_src>

<mosaic_0001>
module attributes {stable_mosaic.version = 11 : i64} {
  func.func @_grn_kernel(%arg0: i32, %arg1: memref<16x16xf32, #tpu.memory_space<vmem>>, %arg2: memref<16x32xf32, #tpu.memory_space<vmem>>, %arg3: memref<1x32xf32, #tpu.memory_space<vmem>>, %arg4: memref<32x16xf32, #tpu.memory_space<vmem>>, %arg5: memref<1x16xf32, #tpu.memory_space<vmem>>, %arg6: memref<16x16xf32, #tpu.memory_space<vmem>>, %arg7: memref<1x16xf32, #tpu.memory_space<vmem>>, %arg8: memref<1x16xf32, #tpu.memory_space<vmem>>, %arg9: memref<1x16xf32, #tpu.memory_space<vmem>>, %arg10: memref<16x16xf32, #tpu.memory_space<vmem>>) attributes {dimension_semantics = [#tpu.dimension_semantics<parallel>], iteration_bounds = array<i64: 1>, scalar_prefetch = 0 : i64, scratch_operands = 0 : i64, tpu.core_type = #tpu.core_type<tc>, window_params = [{transform_indices = @transform_0, window_bounds = array<i64: 16, 16>}, {pipeline_mode = #tpu.pipeline_mode<synchronous>, transform_indices = @transform_1, window_bounds = array<i64: 16, 32>}, {pipeline_mode = #tpu.pipeline_mode<synchronous>, transform_indices = @transform_2, window_bounds = array<i64: 1, 32>}, {pipeline_mode = #tpu.pipeline_mode<synchronous>, transform_indices = @transform_3, window_bounds = array<i64: 32, 16>}, {pipeline_mode = #tpu.pipeline_mode<synchronous>, transform_indices = @transform_4, window_bounds = array<i64: 1, 16>}, {pipeline_mode = #tpu.pipeline_mode<synchronous>, transform_indices = @transform_5, window_bounds = array<i64: 16, 16>}, {pipeline_mode = #tpu.pipeline_mode<synchronous>, transform_indices = @transform_6, window_bounds = array<i64: 1, 16>}, {pipeline_mode = #tpu.pipeline_mode<synchronous>, transform_indices = @transform_7, window_bounds = array<i64: 1, 16>}, {pipeline_mode = #tpu.pipeline_mode<synchronous>, transform_indices = @transform_8, window_bounds = array<i64: 1, 16>}, {transform_indices = @transform_9, window_bounds = array<i64: 16, 16>}]} {
    %c0 = arith.constant 0 : index
    %c0_0 = arith.constant 0 : index
    %0 = vector.load %arg1[%c0, %c0_0] : memref<16x16xf32, #tpu.memory_space<vmem>>, vector<16x16xf32>
    %c0_1 = arith.constant 0 : index
    %c0_2 = arith.constant 0 : index
    %1 = vector.load %arg2[%c0_1, %c0_2] : memref<16x32xf32, #tpu.memory_space<vmem>>, vector<16x32xf32>
    %cst = arith.constant dense<0.000000e+00> : vector<16x32xf32>
    %2 = tpu.matmul %0, %1, %cst {dimension_numbers = #tpu.dot_dimension_numbers<[1], [0], [0], [1], [0, 0, 1, 1], [], []>} : vector<16x16xf32>, vector<16x32xf32>, vector<16x32xf32> -> vector<16x32xf32>
    %c0_3 = arith.constant 0 : index
    %c0_4 = arith.constant 0 : index
    %3 = vector.load %arg3[%c0_3, %c0_4] : memref<1x32xf32, #tpu.memory_space<vmem>>, vector<1x32xf32>
    %4 = vector.broadcast %3 : vector<1x32xf32> to vector<16x32xf32>
    %5 = arith.addf %2, %4 : vector<16x32xf32>
    %cst_5 = arith.constant 0.000000e+00 : f32
    %6 = vector.broadcast %cst_5 : f32 to vector<16x32xf32>
    %7 = arith.cmpf ogt, %5, %6 : vector<16x32xf32>
    %cst_6 = arith.constant 0.000000e+00 : f32
    %8 = vector.broadcast %cst_6 : f32 to vector<16x32xf32>
    %9 = arith.minimumf %5, %8 : vector<16x32xf32>
    %10 = math.exp %9 : vector<16x32xf32>
    %cst_7 = arith.constant 1.000000e+00 : f32
    %11 = vector.broadcast %cst_7 : f32 to vector<16x32xf32>
    %12 = arith.subf %10, %11 : vector<16x32xf32>
    %13 = arith.select %7, %5, %12 : vector<16x32xi1>, vector<16x32xf32>
    %c0_8 = arith.constant 0 : index
    %c0_9 = arith.constant 0 : index
    %14 = vector.load %arg4[%c0_8, %c0_9] : memref<32x16xf32, #tpu.memory_space<vmem>>, vector<32x16xf32>
    %cst_10 = arith.constant dense<0.000000e+00> : vector<16x16xf32>
    %15 = tpu.matmul %13, %14, %cst_10 {dimension_numbers = #tpu.dot_dimension_numbers<[1], [0], [0], [1], [0, 0, 1, 1], [], []>} : vector<16x32xf32>, vector<32x16xf32>, vector<16x16xf32> -> vector<16x16xf32>
    %c0_11 = arith.constant 0 : index
    %c0_12 = arith.constant 0 : index
    %16 = vector.load %arg5[%c0_11, %c0_12] : memref<1x16xf32, #tpu.memory_space<vmem>>, vector<1x16xf32>
    %17 = vector.broadcast %16 : vector<1x16xf32> to vector<16x16xf32>
    %18 = arith.addf %15, %17 : vector<16x16xf32>
    %c0_13 = arith.constant 0 : index
    %c0_14 = arith.constant 0 : index
    %19 = vector.load %arg6[%c0_13, %c0_14] : memref<16x16xf32, #tpu.memory_space<vmem>>, vector<16x16xf32>
    %cst_15 = arith.constant dense<0.000000e+00> : vector<16x16xf32>
    %20 = tpu.matmul %18, %19, %cst_15 {dimension_numbers = #tpu.dot_dimension_numbers<[1], [0], [0], [1], [0, 0, 1, 1], [], []>} : vector<16x16xf32>, vector<16x16xf32>, vector<16x16xf32> -> vector<16x16xf32>
    %c0_16 = arith.constant 0 : index
    %c0_17 = arith.constant 0 : index
    %21 = vector.load %arg7[%c0_16, %c0_17] : memref<1x16xf32, #tpu.memory_space<vmem>>, vector<1x16xf32>
    %22 = vector.broadcast %21 : vector<1x16xf32> to vector<16x16xf32>
    %23 = arith.addf %20, %22 : vector<16x16xf32>
    %cst_18 = arith.constant 0.000000e+00 : f32
    %24 = vector.broadcast %cst_18 : f32 to vector<16x16xf32>
    %25 = arith.subf %24, %23 : vector<16x16xf32>
    %26 = math.exp %25 : vector<16x16xf32>
    %cst_19 = arith.constant 1.000000e+00 : f32
    %27 = vector.broadcast %cst_19 : f32 to vector<16x16xf32>
    %28 = arith.addf %27, %26 : vector<16x16xf32>
    %cst_20 = arith.constant 1.000000e+00 : f32
    %29 = vector.broadcast %cst_20 : f32 to vector<16x16xf32>
    %30 = arith.divf %29, %28 : vector<16x16xf32>
    %31 = arith.mulf %30, %18 : vector<16x16xf32>
    %32 = arith.addf %31, %0 : vector<16x16xf32>
    %cst_21 = arith.constant dense<0.000000e+00> : vector<16xf32>
    %33 = vector.multi_reduction <add>, %32, %cst_21 [1] : vector<16x16xf32> to vector<16xf32>
    %34 = vector.shape_cast %33 : vector<16xf32> to vector<16x1xf32>
    %cst_22 = arith.constant 1.600000e+01 : f32
    %35 = vector.broadcast %cst_22 : f32 to vector<16x1xf32>
    %36 = arith.divf %34, %35 : vector<16x1xf32>
    %37 = vector.broadcast %36 : vector<16x1xf32> to vector<16x16xf32>
    %38 = arith.subf %32, %37 : vector<16x16xf32>
    %39 = arith.mulf %38, %38 : vector<16x16xf32>
    %cst_23 = arith.constant dense<0.000000e+00> : vector<16xf32>
    %40 = vector.multi_reduction <add>, %39, %cst_23 [1] : vector<16x16xf32> to vector<16xf32>
    %41 = vector.shape_cast %40 : vector<16xf32> to vector<16x1xf32>
    %cst_24 = arith.constant 1.600000e+01 : f32
    %42 = vector.broadcast %cst_24 : f32 to vector<16x1xf32>
    %43 = arith.divf %41, %42 : vector<16x1xf32>
    %cst_25 = arith.constant 9.99999974E-6 : f32
    %44 = vector.broadcast %cst_25 : f32 to vector<16x1xf32>
    %45 = arith.addf %43, %44 : vector<16x1xf32>
    %46 = math.rsqrt %45 : vector<16x1xf32>
    %47 = vector.broadcast %46 : vector<16x1xf32> to vector<16x16xf32>
    %48 = arith.mulf %38, %47 : vector<16x16xf32>
    %c0_26 = arith.constant 0 : index
    %c0_27 = arith.constant 0 : index
    %49 = vector.load %arg8[%c0_26, %c0_27] : memref<1x16xf32, #tpu.memory_space<vmem>>, vector<1x16xf32>
    %50 = vector.broadcast %49 : vector<1x16xf32> to vector<16x16xf32>
    %51 = arith.mulf %48, %50 : vector<16x16xf32>
    %c0_28 = arith.constant 0 : index
    %c0_29 = arith.constant 0 : index
    %52 = vector.load %arg9[%c0_28, %c0_29] : memref<1x16xf32, #tpu.memory_space<vmem>>, vector<1x16xf32>
    %53 = vector.broadcast %52 : vector<1x16xf32> to vector<16x16xf32>
    %54 = arith.addf %51, %53 : vector<16x16xf32>
    %c0_30 = arith.constant 0 : index
    %c0_31 = arith.constant 0 : index
    %55 = vector.load %arg10[%c0_30, %c0_31] : memref<16x16xf32, #tpu.memory_space<vmem>>, vector<16x16xf32>
    tpu.vector_store %arg10[%c0_30, %c0_31], %54 {strides = array<i32>} : memref<16x16xf32, #tpu.memory_space<vmem>>, vector<16x16xf32>,
    return
  }
  func.func @transform_0(%arg0: i32) -> (i32, i32) {
    %c0_i32 = arith.constant 0 : i32
    %c0_i32_0 = arith.constant 0 : i32
    return %arg0, %c0_i32 : i32, i32
  }
  func.func @transform_1(%arg0: i32) -> (i32, i32) {
    %c0_i32 = arith.constant 0 : i32
    %c0_i32_0 = arith.constant 0 : i32
    %c0_i32_1 = arith.constant 0 : i32
    return %c0_i32, %c0_i32_0 : i32, i32
  }
  func.func @transform_2(%arg0: i32) -> (i32, i32) {
    %c0_i32 = arith.constant 0 : i32
    %c0_i32_0 = arith.constant 0 : i32
    %c0_i32_1 = arith.constant 0 : i32
    return %c0_i32, %c0_i32_0 : i32, i32
  }
  func.func @transform_3(%arg0: i32) -> (i32, i32) {
    %c0_i32 = arith.constant 0 : i32
    %c0_i32_0 = arith.constant 0 : i32
    %c0_i32_1 = arith.constant 0 : i32
    return %c0_i32, %c0_i32_0 : i32, i32
  }
  func.func @transform_4(%arg0: i32) -> (i32, i32) {
    %c0_i32 = arith.constant 0 : i32
    %c0_i32_0 = arith.constant 0 : i32
    %c0_i32_1 = arith.constant 0 : i32
    return %c0_i32, %c0_i32_0 : i32, i32
  }
  func.func @transform_5(%arg0: i32) -> (i32, i32) {
    %c0_i32 = arith.constant 0 : i32
    %c0_i32_0 = arith.constant 0 : i32
    %c0_i32_1 = arith.constant 0 : i32
    return %c0_i32, %c0_i32_0 : i32, i32
  }
  func.func @transform_6(%arg0: i32) -> (i32, i32) {
    %c0_i32 = arith.constant 0 : i32
    %c0_i32_0 = arith.constant 0 : i32
    %c0_i32_1 = arith.constant 0 : i32
    return %c0_i32, %c0_i32_0 : i32, i32
  }
  func.func @transform_7(%arg0: i32) -> (i32, i32) {
    %c0_i32 = arith.constant 0 : i32
    %c0_i32_0 = arith.constant 0 : i32
    %c0_i32_1 = arith.constant 0 : i32
    return %c0_i32, %c0_i32_0 : i32, i32
  }
  func.func @transform_8(%arg0: i32) -> (i32, i32) {
    %c0_i32 = arith.constant 0 : i32
    %c0_i32_0 = arith.constant 0 : i32
    %c0_i32_1 = arith.constant 0 : i32
    return %c0_i32, %c0_i32_0 : i32, i32
  }
  func.func @transform_9(%arg0: i32) -> (i32, i32) {
    %c0_i32 = arith.constant 0 : i32
    %c0_i32_0 = arith.constant 0 : i32
    return %arg0, %c0_i32 : i32, i32
  }
}

</mosaic_0001>

<bundles_post_ra>
// kernel: grn_forward.1
= control target key start
LH: loop header
LB: loop body
LE: loop exit
PB: predicated region body
PF: predicated region fallthrough
CT: control target
= control target key end

     0   :  { %vm44_vm0 = vcmask 130048   ;;  %s639_s0 = inlined_call_operand.vmem [shape: f32[16,16], index: 0, kind: input, shape index: {}]   ;;  %s640_s1 = inlined_call_operand.vmem [shape: f32[16,32], index: 1, kind: input, shape index: {}]   ;;  %s641_s2 = inlined_call_operand.vmem [shape: f32[1,32], index: 2, kind: input, shape index: {}]   ;;  %s642_s3 = inlined_call_operand.vmem [shape: f32[32,16], index: 3, kind: input, shape index: {}]   ;;  %s643_s4 = inlined_call_operand.vmem [shape: f32[1,16], index: 4, kind: input, shape index: {}]   ;;  %s644_s5 = inlined_call_operand.vmem [shape: f32[16,16], index: 5, kind: input, shape index: {}]   ;;  %s645_s6 = inlined_call_operand.vmem [shape: f32[1,16], index: 6, kind: input, shape index: {}]   ;;  %s646_s7 = inlined_call_operand.vmem [shape: f32[1,16], index: 7, kind: input, shape index: {}]   ;;  %s647_s8 = inlined_call_operand.vmem [shape: f32[1,16], index: 8, kind: input, shape index: {}]   ;;  %s648_s9 = inlined_call_operand.hbm [shape: f32[16,16], index: 9, kind: output, shape index: {}]  }
   0x1   :  { %v35_v0 = vld [vmem:[%s640_s1] sm:$0xff]  ;;  %v36_v1 = vld [vmem:[%s640_s1 + $0x8] sm:$0xff] }
   0x2   :  { %v573_v2 = vld [vmem:[%s639_s0] sm:$0xff]  ;;  %v452_v3 = vpack.c.bf16 %v36_v1, %v35_v0 }
   0x3   :  { %431 = vmatprep.mubr.msk.f32.mxu0 %vm44_vm0, %v573_v2 }
   0x4   :  { %14 = vsyncpa [#allocation3], 0  ;;  %453 = vmatprep.subr.bf16.mxu0 %v452_v3  ;;  %v580_v4 = vld [vmem:[%s639_s0 + $0x8] sm:$0xff]  ;;  %v138_v5 = vld [vmem:[%s642_s3] sm:$0xff]  ;;  %vm149_vm1 = vcmask 261120   ;;  %s511_s11 = smov [#allocation2]  }
   0x5   :  { %455 = vmatpush3.bf16.msra.mxu0 %v452_v3  ;;  %v139_v6 = vld [vmem:[%s642_s3 + $0x8] sm:$0xff]  ;;  %v140_v7 = vld [vmem:[%s642_s3 + $0x10] sm:$0xff]  ;;  %v141_v9 = vld [vmem:[%s642_s3 + $0x18] sm:$0xff]  ;;  %s389_s12 = sshll.u32 %s511_s11, 4  ;;  %s390_s12 = int_to_ptr.vmem [resolvable:$true] %s389_s12 }
   0x6   :  { %v456_v8 = vpack.c.bf16 %v139_v6, %v138_v5  ;;  %v460_v10 = vpack.c.bf16 %v141_v9, %v140_v7  ;;  %v400_v11 = vld [vmem:[%s641_s2] ss:$0 sm:$0xff]  ;;  %v232_v27 = vld [vmem:[%s644_s5 + $0x8] sm:$0xff]  ;;  %s487_s13 = scalar_lea.vmem %s390_s12, 256  ;;  %p492_p1 = scmp.lt.s32.totalorder %s390_s12, %s390_s12 }
   0x7   :  { %v231_v26 = vld [vmem:[%s644_s5] sm:$0xff]  ;;  %p488_p0 = scmp.ne.s32.totalorder %s390_s12, %s487_s13  ;;  %p493_p2 = scmp.lt.s32.totalorder %s487_s13, %s487_s13 }
   0x8   :  { %432 = vmatmul.mubr.msk.f32.vlgmr.msra.gmra.mrb[0].mxu0 %vm44_vm0, %v580_v4  ;;  %457 = vmatprep.subr.bf16.mxu1 %v456_v8  ;;  %v464_v28 = vpack.c.bf16 %v232_v27, %v231_v26  ;;  %v405_v29 = vld [vmem:[%s643_s4] ss:$0 sm:$0xff] }
   0x9   :  { %459 = vmatpush3.bf16.msra.mxu1 %v456_v8  ;;  %v408_v34 = vld [vmem:[%s645_s6] ss:$0 sm:$0xff]  ;;  %p494_p3 = por %p493_p2, %p492_p1 }
   0xa   :  { %461 = vmatprep.subr.bf16.mxu1 %v460_v10  ;;  %465 = vmatprep.subr.bf16.mxu0 %v464_v28  ;;  %v411_v8 = vld [vmem:[%s646_s7] ss:$0 sm:$0xff] }
   0xb   :  { %467 = vmatpush3.bf16.msra.mxu0 %v464_v28  ;;  %p495_p4 = pnand %p494_p3, %p488_p0 }
   0xd   :  { %463 = vmatpush3.bf16.msra.mxu1 %v460_v10  ;;  %v412_v10 = vld [vmem:[%s647_s8] ss:$0 sm:$0xff] }
  0xdb   :  { %v433_v12 = vpop.f32.mrb[0].mxu0 }
  0xdc   :  { %v123_v13 = vadd.f32 %v433_v12, %v400_v11  ;;  %v117_v14 = vpop.f32.mrb[1].mxu0 }
  0xdd   :  { %v118_v15 = vadd.f32 %v400_v11, %v117_v14 }
  0xde   :  { %v129_v16 = vmin.f32 %v123_v13, 0.0  ;;  %vm127_vm3 = vcmp.gt.f32.partialorder %v123_v13, 0.0 }
  0xdf   :  { %v128_v17 = vmin.f32 %v118_v15, 0.0  ;;  %vm126_vm2 = vcmp.gt.f32.partialorder %v118_v15, 0.0 }
  0xe0   :  { %v132_v18 = vmul.f32 1.442695, %v129_v16 }
  0xe1   :  { %v130_v19 = vmul.f32 1.442695, %v128_v17 }
  0xe2   :  { %471 = vpow2.f32 %v132_v18 }
  0xe3   :  { %473 = vpow2.f32 %v130_v19 }
  0xec   :  { %v472_v20 = vpop.eup %471 }
  0xed   :  { %v474_v21 = vpop.eup %473  ;;  %v404_v22 = vadd.f32 -1.0, %v472_v20 }
  0xee   :  { %v403_v23 = vadd.f32 -1.0, %v474_v21 }
  0xef   :  { %v137_v25 = vsel %vm127_vm3, %v123_v13, %v404_v22 }
  0xf0   :  { %v136_v24 = vsel %vm126_vm2, %v118_v15, %v403_v23 }
  0xf1   :  { %442 = vmatprep.mubr.msk.f32.mxu1 %vm149_vm1, %v136_v24 }
  0xf2   :  { %443 = vmatmul.mubr.msk.f32.vlgmr.msra.gmra.mrb[0].mxu1 %vm149_vm1, %v137_v25 }
 0x1c5   :  { %v444_v30 = vpop.f32.mrb[0].mxu1 }
 0x1c6   :  { %v222_v31 = vpop.f32.mrb[1].mxu1  ;;  %v228_v33 = vadd.f32 %v444_v30, %v405_v29 }
 0x1c7   :  { %v223_v32 = vadd.f32 %v405_v29, %v222_v31 }
 0x1c9   :  { %449 = vmatprep.mubr.msk.f32.mxu0 %vm44_vm0, %v223_v32 }
 0x1ca   :  { %450 = vmatmul.mubr.msk.f32.vlgmr.msra.gmra.mrb[2].mxu0 %vm44_vm0, %v228_v33 }
 0x29d   :  { %v451_v35 = vpop.f32.mrb[2].mxu0 }
 0x29e   :  { %v318_v36 = vadd.f32 %v451_v35, %v408_v34  ;;  %v312_v37 = vpop.f32.mrb[3].mxu0 }
 0x29f   :  { %v313_v38 = vadd.f32 %v408_v34, %v312_v37 }
 0x2a0   :  { %v322_v39 = vsub.f32 0.0, %v318_v36 }
 0x2a1   :  { %v321_v40 = vsub.f32 0.0, %v313_v38 }
 0x2a2   :  { %v325_v41 = vmul.f32 1.442695, %v322_v39 }
 0x2a3   :  { %v323_v42 = vmul.f32 1.442695, %v321_v40 }
 0x2a4   :  { %475 = vpow2.f32 %v325_v41 }
 0x2a5   :  { %477 = vpow2.f32 %v323_v42 }
 0x2ae   :  { %v476_v43 = vpop.eup %475 }
 0x2af   :  { %v478_v44 = vpop.eup %477  ;;  %v328_v45 = vadd.f32 1.0, %v476_v43 }
 0x2b0   :  { %v327_v46 = vadd.f32 1.0, %v478_v44 }
 0x2b1   :  { %479 = vrcp.f32 %v328_v45 }
 0x2b2   :  { %481 = vrcp.f32 %v327_v46 }
 0x2bb   :  { %v480_v47 = vpop.eup %479 }
 0x2bc   :  { %v482_v48 = vpop.eup %481  ;;  %v334_v50 = vmul.f32 %v480_v47, %v228_v33 }
 0x2bd   :  { %v333_v49 = vmul.f32 %v482_v48, %v223_v32 }
 0x2be   :  { %v336_v53 = vadd.f32 %v334_v50, %v580_v4 }
 0x2bf   :  { %v335_v51 = vadd.f32 %v333_v49, %v573_v2 }
 0x2c0   :  { %v340_v54 = vsel %vm44_vm0, %v336_v53, 0.0 }
 0x2c1   :  { %v337_v52 = vsel %vm44_vm0, %v335_v51, 0.0 }
 0x2c2   :  { %338 = vadd.xlane.f32.xlu0 %v337_v52 }
 0x2c6   :  { %341 = vadd.xlane.f32.xlu0 %v340_v54 }
 0x34f   :  { %v339_v55 = vpop.xlane.xlu0 %338 }
 0x350   :  { %v344_v56 = vmul.f32 0.0625, %v339_v55 }
 0x352   :  { %v346_v57 = vsub.f32 %v335_v51, %v344_v56 }
 0x353   :  { %v342_v58 = vpop.xlane.xlu0 %341 }
 0x354   :  { %v345_v59 = vmul.f32 0.0625, %v342_v58  ;;  %v348_v60 = vmul.f32 %v346_v57, %v346_v57 }
 0x356   :  { %v347_v61 = vsub.f32 %v336_v53, %v345_v59  ;;  %v350_v62 = vsel %vm44_vm0, %v348_v60, 0.0 }
 0x357   :  { %351 = vadd.xlane.f32.xlu1 %v350_v62 }
 0x358   :  { %v349_v63 = vmul.f32 %v347_v61, %v347_v61 }
 0x35a   :  { %v353_v0 = vsel %vm44_vm0, %v349_v63, 0.0 }
 0x35b   :  { %354 = vadd.xlane.f32.xlu1 %v353_v0 }
 0x3e4   :  { %v352_v1 = vpop.xlane.xlu1 %351 }
 0x3e5   :  { %v356_v2 = vmul.f32 0.0625, %v352_v1 }
 0x3e7   :  { %v358_v3 = vadd.f32 1e-05, %v356_v2 }
 0x3e8   :  { %v355_v4 = vpop.xlane.xlu1 %354 }
 0x3e9   :  { %483 = vrsqrt.f32 %v358_v3  ;;  %v357_v5 = vmul.f32 0.0625, %v355_v4 }
 0x3eb   :  { %v359_v6 = vadd.f32 1e-05, %v357_v5 }
 0x3ed   :  { %485 = vrsqrt.f32 %v359_v6 }
 0x3f3   :  { %v484_v7 = vpop.eup %483 }
 0x3f4   :  { %v362_v9 = vmul.f32 %v484_v7, %v346_v57 }
 0x3f6   :  { %v371_v11 = vmul.f32 %v411_v8, %v362_v9 }
 0x3f7   :  { %v486_v12 = vpop.eup %485 }
 0x3f8   :  { %v363_v13 = vmul.f32 %v486_v12, %v347_v61  ;;  %v380_v14 = vadd.f32 %v412_v10, %v371_v11 }
 0x3fa   :  { %v372_v15 = vmul.f32 %v411_v8, %v363_v13  ;;  %382 = vst.msk [vmem:[#allocation2] sm:$0xff] %vm44_vm0, %v380_v14 }
 0x3fc   :  { %v381_v16 = vadd.f32 %v412_v10, %v372_v15 }
 0x3fe   :  { %383 = vst.msk [vmem:[#allocation2 + $0x8] sm:$0xff] %vm44_vm0, %v381_v16 }
 0x3ff   :  { %498 = shalt.err (!%p495_p4)
}
 0x400   :  { %s499_s14 = scalar_lea.hbm %s648_s9, 256 }
 0x401   :  { %p500_p5 = scmp.ne.s32.totalorder %s648_s9, %s499_s14  ;;  %p503_p6 = scmp.lt.u32.totalorder %s499_s14, %s648_s9 }
 0x403   :  { %p505_p7 = pnand %p503_p6, %p500_p5 }
 0x405   :  { %508 = shalt.err (!%p505_p7)
}
 0x406   :  { %s512_s18 = smov 128   ;;  %s513_s19 = smov 8  }
 0x407   :  { %395 = dma.vmem_to_hbm [thread:$0]  %s390_s12, 256, %s648_s9, [#allocation3], %s512_s18, %s512_s18, %s513_s19  }
 0x408   :  { %509 = dma.done.wait [#allocation3], 256  }
 0x409   :  { %510 = vsyncadd [#allocation3], 4294967040 }
 0x40a   :  { %399 = vsyncpa [#allocation3], 1 }

</bundles_post_ra>
